<compile_context>
chip_gen: v7x
topology: tpu7x:2x2x1
jax: 0.10.0
libtpu: 0.0.40
codegen_flags: <defaults>
</compile_context>

<pallas_src>
import math

import jax
import jax.numpy as jnp
from jax import lax
from jax.experimental import pallas as pl
from jax.experimental.pallas import tpu as pltpu


def _gelu_exact(x):
    # matches torch.nn.functional.gelu default (erf-based), computed in f32
    return 0.5 * x * (1.0 + lax.erf(x * (1.0 / math.sqrt(2.0))))


def ffn_kernel(x_ref, w1_ref, b1_ref, w2_ref, b2_ref, o_ref):
    # x_ref:  (1, C, tn)   spatial tile; channels on sublanes, pixels on lanes
    # w1_ref: (hid2, C)    project_in weight, conv orientation (bf16)
    # b1_ref: (hid2, 1)    f32
    # w2_ref: (C, hid2)    project_out weight (bf16)
    # b2_ref: (C, 1)       f32
    # o_ref:  (1, C, tn)
    mxu_dtype = w1_ref.dtype
    x = x_ref[0].astype(mxu_dtype)                                # (C, tn)
    h = jnp.dot(w1_ref[...], x,
                preferred_element_type=jnp.float32) + b1_ref[...]  # (hid2, tn) f32
    h = _gelu_exact(h)                                             # f32 elementwise
    out = jnp.dot(w2_ref[...], h.astype(mxu_dtype),
                  preferred_element_type=jnp.float32) + b2_ref[...]  # (C, tn) f32
    o_ref[0] = out.astype(o_ref.dtype)


def feed_forward(x_nchw, w1, b1, w2, b2, *, tn=512, mxu_dtype=jnp.bfloat16):
    """x_nchw: (B, C, H, W).  w1: (2*hidden, C), w2: (C, 2*hidden) — conv layout."""
    B, C, H, W = x_nchw.shape
    hid2 = w1.shape[0]
    assert w1.shape == (hid2, C) and w2.shape == (C, hid2)
    assert b1.shape == (hid2,) and b2.shape == (C,)
    assert tn % 128 == 0

    S = H * W
    # clamp the spatial tile to the 128-aligned spatial extent, then pad S
    tn = min(tn, pl.cdiv(S, 128) * 128)
    S_pad = pl.cdiv(S, tn) * tn

    x_tok = x_nchw.reshape(B, C, S)               # free reshape, no transpose
    if S_pad != S:
        x_tok = jnp.pad(x_tok, ((0, 0), (0, 0), (0, S_pad - S)))

    w1m = w1.astype(mxu_dtype)
    w2m = w2.astype(mxu_dtype)
    b1c = b1.reshape(hid2, 1).astype(jnp.float32)
    b2c = b2.reshape(C, 1).astype(jnp.float32)

    x_bytes = x_tok.dtype.itemsize
    w_bytes = jnp.dtype(mxu_dtype).itemsize
    # VMEM estimate: double-buffered x/out tiles + single-buffered weights +
    # f32 intermediate + bf16 dot temps; 2x headroom, clamped to [32, 64] MiB
    # (64 MiB cap keeps it legal on v7x, floor raises the small v5e default).
    est = (2 * 2 * C * tn * x_bytes
           + 2 * C * hid2 * w_bytes + (hid2 + C) * 4
           + hid2 * tn * 4 + (hid2 + C) * tn * w_bytes)
    vmem_limit = int(min(max(2 * est + (4 << 20), 32 << 20), 64 << 20))

    cost = pl.CostEstimate(
        flops=4 * B * S_pad * C * hid2,              # two matmuls
        transcendentals=B * S_pad * hid2,            # erf per hidden element
        bytes_accessed=(B * S * C * x_bytes          # x in
                        + B * S * C * x_bytes        # out
                        + 2 * C * hid2 * w_bytes     # weights
                        + (hid2 + C) * 4),           # biases
    )

    const_map = lambda b, s: (0, 0)
    out = pl.pallas_call(
        ffn_kernel,
        out_shape=jax.ShapeDtypeStruct((B, C, S_pad), x_nchw.dtype),
        grid_spec=pltpu.PrefetchScalarGridSpec(
            num_scalar_prefetch=0,
            grid=(B, S_pad // tn),
            in_specs=[
                pl.BlockSpec((1, C, tn), lambda b, s: (b, 0, s)),   # x tile
                pl.BlockSpec((hid2, C), const_map,
                             pipeline_mode=pl.Buffered(1)),          # W1 (resident)
                pl.BlockSpec((hid2, 1), const_map,
                             pipeline_mode=pl.Buffered(1)),          # b1
                pl.BlockSpec((C, hid2), const_map,
                             pipeline_mode=pl.Buffered(1)),          # W2 (resident)
                pl.BlockSpec((C, 1), const_map,
                             pipeline_mode=pl.Buffered(1)),          # b2
            ],
            out_specs=pl.BlockSpec((1, C, tn), lambda b, s: (b, 0, s)),
        ),
        compiler_params=pltpu.CompilerParams(
            dimension_semantics=("parallel", "parallel"),
            vmem_limit_bytes=vmem_limit,
        ),
        cost_estimate=cost,
    )(x_tok, w1m, b1c, w2m, b2c)

    if S_pad != S:
        out = out[:, :, :S]
    return out.reshape(B, C, H, W)


def init_params(key, dim, ffn_expansion_factor, dtype=jnp.float32):
    hidden = int(dim * ffn_expansion_factor)
    hid2 = hidden * 2
    k1, k2, k3, k4 = jax.random.split(key, 4)
    # Conv2d(dim, hid2, 1) weight is (hid2, dim, 1, 1); we keep that (out, in)
    # orientation directly.  Uniform init mimicking torch kaiming-uniform.
    bound1 = 1.0 / math.sqrt(dim)
    w1 = jax.random.uniform(k1, (hid2, dim), dtype, -bound1, bound1)
    b1 = jax.random.uniform(k2, (hid2,), dtype, -bound1, bound1)
    bound2 = 1.0 / math.sqrt(hid2)
    w2 = jax.random.uniform(k3, (dim, hid2), dtype, -bound2, bound2)
    b2 = jax.random.uniform(k4, (dim,), dtype, -bound2, bound2)
    return w1, b1, w2, b2


def reference(x_nchw, w1, b1, w2, b2, mxu_dtype=None):
    # pure-JAX reference of the PyTorch forward (1x1 conv == channel matmul).
    # If mxu_dtype is given, mirror the kernel's bf16 MXU inputs / f32 accum.
    B, C, H, W = x_nchw.shape
    hid2 = w1.shape[0]
    x = x_nchw.reshape(B, C, H * W)
    if mxu_dtype is None:
        h = jnp.einsum("oc,bcs->bos", w1, x) + b1[None, :, None]
        h = _gelu_exact(h)
        o = jnp.einsum("co,bos->bcs", w2, h) + b2[None, :, None]
    else:
        h = jnp.einsum("oc,bcs->bos", w1.astype(mxu_dtype), x.astype(mxu_dtype),
                       preferred_element_type=jnp.float32) + b1[None, :, None]
        h = _gelu_exact(h)
        o = jnp.einsum("co,bos->bcs", w2.astype(mxu_dtype), h.astype(mxu_dtype),
                       preferred_element_type=jnp.float32) + b2[None, :, None]
    return o.reshape(B, C, H, W).astype(x_nchw.dtype)


if __name__ == "__main__":
    dim = 4
    ffn_expansion_factor = 2       # hidden = 8, hidden*2 = 16
    B, H, W = 2, 16, 16

    key = jax.random.PRNGKey(0)
    kx, kp = jax.random.split(key)
    x = jax.random.normal(kx, (B, dim, H, W), jnp.float32)
    w1, b1, w2, b2 = init_params(kp, dim, ffn_expansion_factor)

    out = feed_forward(x, w1, b1, w2, b2)
    out = jax.block_until_ready(out)
    assert out.shape == (B, dim, H, W)

    # tight check vs a reference using the same bf16 MXU inputs / f32 accum
    ref_bf16 = reference(x, w1, b1, w2, b2, mxu_dtype=jnp.bfloat16)
    assert jnp.allclose(out, ref_bf16, atol=2e-3, rtol=2e-3)

    # loose check vs the exact f32 torch-semantics reference
    ref_f32 = reference(x, w1, b1, w2, b2)
    assert jnp.allclose(out, ref_f32, atol=5e-2, rtol=5e-2)

    print("KERNEL_OK")
</pallas_src>

<mosaic_0001>
module attributes {stable_mosaic.version = 11 : i64} {
  func.func @ffn_kernel(%arg0: i32, %arg1: i32, %arg2: memref<1x4x256xf32, #tpu.memory_space<vmem>>, %arg3: memref<16x4xbf16, #tpu.memory_space<vmem>>, %arg4: memref<16x1xf32, #tpu.memory_space<vmem>>, %arg5: memref<4x16xbf16, #tpu.memory_space<vmem>>, %arg6: memref<4x1xf32, #tpu.memory_space<vmem>>, %arg7: memref<1x4x256xf32, #tpu.memory_space<vmem>>) attributes {dimension_semantics = [#tpu.dimension_semantics<parallel>, #tpu.dimension_semantics<parallel>], iteration_bounds = array<i64: 2, 1>, scalar_prefetch = 0 : i64, scratch_operands = 0 : i64, tpu.core_type = #tpu.core_type<tc>, window_params = [{transform_indices = @transform_0, window_bounds = array<i64: 1, 4, 256>}, {pipeline_mode = #tpu.pipeline_mode<synchronous>, transform_indices = @transform_1, window_bounds = array<i64: 16, 4>}, {pipeline_mode = #tpu.pipeline_mode<synchronous>, transform_indices = @transform_2, window_bounds = array<i64: 16, 1>}, {pipeline_mode = #tpu.pipeline_mode<synchronous>, transform_indices = @transform_3, window_bounds = array<i64: 4, 16>}, {pipeline_mode = #tpu.pipeline_mode<synchronous>, transform_indices = @transform_4, window_bounds = array<i64: 4, 1>}, {transform_indices = @transform_5, window_bounds = array<i64: 1, 4, 256>}]} {
    %c0 = arith.constant 0 : index
    %c0_0 = arith.constant 0 : index
    %c0_1 = arith.constant 0 : index
    %0 = vector.load %arg2[%c0, %c0_0, %c0_1] : memref<1x4x256xf32, #tpu.memory_space<vmem>>, vector<1x4x256xf32>
    %1 = vector.shape_cast %0 : vector<1x4x256xf32> to vector<4x256xf32>
    %2 = arith.truncf %1 : vector<4x256xf32> to vector<4x256xbf16>
    %c0_2 = arith.constant 0 : index
    %c0_3 = arith.constant 0 : index
    %3 = vector.load %arg3[%c0_2, %c0_3] : memref<16x4xbf16, #tpu.memory_space<vmem>>, vector<16x4xbf16>
    %cst = arith.constant dense<0.000000e+00> : vector<16x256xf32>
    %4 = tpu.matmul %3, %2, %cst {dimension_numbers = #tpu.dot_dimension_numbers<[1], [0], [0], [1], [0, 0, 1, 1], [], []>} : vector<16x4xbf16>, vector<4x256xbf16>, vector<16x256xf32> -> vector<16x256xf32>
    %c0_4 = arith.constant 0 : index
    %c0_5 = arith.constant 0 : index
    %5 = vector.load %arg4[%c0_4, %c0_5] : memref<16x1xf32, #tpu.memory_space<vmem>>, vector<16x1xf32>
    %6 = vector.broadcast %5 : vector<16x1xf32> to vector<16x256xf32>
    %7 = arith.addf %4, %6 : vector<16x256xf32>
    %cst_6 = arith.constant 5.000000e-01 : f32
    %8 = vector.broadcast %cst_6 : f32 to vector<16x256xf32>
    %9 = arith.mulf %8, %7 : vector<16x256xf32>
    %cst_7 = arith.constant 0.707106769 : f32
    %10 = vector.broadcast %cst_7 : f32 to vector<16x256xf32>
    %11 = arith.mulf %7, %10 : vector<16x256xf32>
    %12 = math.erf %11 : vector<16x256xf32>
    %cst_8 = arith.constant 1.000000e+00 : f32
    %13 = vector.broadcast %cst_8 : f32 to vector<16x256xf32>
    %14 = arith.addf %13, %12 : vector<16x256xf32>
    %15 = arith.mulf %9, %14 : vector<16x256xf32>
    %c0_9 = arith.constant 0 : index
    %c0_10 = arith.constant 0 : index
    %16 = vector.load %arg5[%c0_9, %c0_10] : memref<4x16xbf16, #tpu.memory_space<vmem>>, vector<4x16xbf16>
    %17 = arith.truncf %15 : vector<16x256xf32> to vector<16x256xbf16>
    %cst_11 = arith.constant dense<0.000000e+00> : vector<4x256xf32>
    %18 = tpu.matmul %16, %17, %cst_11 {dimension_numbers = #tpu.dot_dimension_numbers<[1], [0], [0], [1], [0, 0, 1, 1], [], []>} : vector<4x16xbf16>, vector<16x256xbf16>, vector<4x256xf32> -> vector<4x256xf32>
    %c0_12 = arith.constant 0 : index
    %c0_13 = arith.constant 0 : index
    %19 = vector.load %arg6[%c0_12, %c0_13] : memref<4x1xf32, #tpu.memory_space<vmem>>, vector<4x1xf32>
    %20 = vector.broadcast %19 : vector<4x1xf32> to vector<4x256xf32>
    %21 = arith.addf %18, %20 : vector<4x256xf32>
    %c0_14 = arith.constant 0 : index
    %c0_15 = arith.constant 0 : index
    %c0_16 = arith.constant 0 : index
    %22 = vector.load %arg7[%c0_14, %c0_15, %c0_16] : memref<1x4x256xf32, #tpu.memory_space<vmem>>, vector<1x4x256xf32>
    %23 = vector.shape_cast %22 : vector<1x4x256xf32> to vector<4x256xf32>
    %24 = vector.shape_cast %21 : vector<4x256xf32> to vector<1x4x256xf32>
    tpu.vector_store %arg7[%c0_14, %c0_15, %c0_16], %24 {strides = array<i32>} : memref<1x4x256xf32, #tpu.memory_space<vmem>>, vector<1x4x256xf32>,
    return
  }
  func.func @transform_0(%arg0: i32, %arg1: i32) -> (i32, i32, i32) {
    %c0_i32 = arith.constant 0 : i32
    %c0_i32_0 = arith.constant 0 : i32
    return %arg0, %c0_i32, %arg1 : i32, i32, i32
  }
  func.func @transform_1(%arg0: i32, %arg1: i32) -> (i32, i32) {
    %c0_i32 = arith.constant 0 : i32
    %c0_i32_0 = arith.constant 0 : i32
    %c0_i32_1 = arith.constant 0 : i32
    return %c0_i32, %c0_i32_0 : i32, i32
  }
  func.func @transform_2(%arg0: i32, %arg1: i32) -> (i32, i32) {
    %c0_i32 = arith.constant 0 : i32
    %c0_i32_0 = arith.constant 0 : i32
    %c0_i32_1 = arith.constant 0 : i32
    return %c0_i32, %c0_i32_0 : i32, i32
  }
  func.func @transform_3(%arg0: i32, %arg1: i32) -> (i32, i32) {
    %c0_i32 = arith.constant 0 : i32
    %c0_i32_0 = arith.constant 0 : i32
    %c0_i32_1 = arith.constant 0 : i32
    return %c0_i32, %c0_i32_0 : i32, i32
  }
  func.func @transform_4(%arg0: i32, %arg1: i32) -> (i32, i32) {
    %c0_i32 = arith.constant 0 : i32
    %c0_i32_0 = arith.constant 0 : i32
    %c0_i32_1 = arith.constant 0 : i32
    return %c0_i32, %c0_i32_0 : i32, i32
  }
  func.func @transform_5(%arg0: i32, %arg1: i32) -> (i32, i32, i32) {
    %c0_i32 = arith.constant 0 : i32
    %c0_i32_0 = arith.constant 0 : i32
    return %arg0, %c0_i32, %arg1 : i32, i32, i32
  }
}

</mosaic_0001>

<bundles_post_ra>
// kernel: tpu_custom_call.1
= control target key start
LH: loop header
LB: loop body
LE: loop exit
PB: predicated region body
PF: predicated region fallthrough
CT: control target
= control target key end

     0   :  { %10 = vsyncpa [#allocation3], 0  ;;  %s832_s0 = inlined_call_operand.vmem [shape: f32[2,4,256], index: 0, kind: input, shape index: {}]   ;;  %s833_s1 = inlined_call_operand.vmem [shape: bf16[16,4], index: 1, kind: input, shape index: {}]   ;;  %s834_s2 = inlined_call_operand.vmem [shape: f32[16,1], index: 2, kind: input, shape index: {}]   ;;  %s835_s3 = inlined_call_operand.vmem [shape: bf16[4,16], index: 3, kind: input, shape index: {}]   ;;  %s836_s4 = inlined_call_operand.vmem [shape: f32[4,1], index: 4, kind: input, shape index: {}]   ;;  %s837_s5 = inlined_call_operand.hbm [shape: f32[2,4,256], index: 5, kind: output, shape index: {}]  }
   0x1   :  { %12 = vsyncpa [#allocation3 + $0x1], 0  ;;  %s705_s18 = smov 0   ;;  %s707_s19 = smov 0  }
   0x2   :  { %s709_s20 = smov 0   ;;  %s711_s21 = smov 0  }
   0x3   :  { %s713_s22 = smov 0   ;;  %s715_s23 = smov 0  }
   0x4 LB: > { %s506_s24 = sadd.s32 4294967295, %s671_s23   ;;  %s507_s25 = sadd.s32 4294967294, %s671_s23   ;;  %s671_s23 = sphi %s715_s23, %s18_s23   ;;  %s667_s22 = sphi %s713_s22, %s844_s22   ;;  %s663_s21 = sphi %s711_s21, %s843_s21   ;;  %s659_s20 = sphi %s709_s20, %s842_s20   ;;  %s655_s19 = sphi %s707_s19, %s841_s19   ;;  %s651_s18 = sphi %s705_s18, %s840_s18  }
   0x5   : > { %s30_s26 = sadd.s32 1, %s667_s22  ;;  %s151_s27 = sadd.s32 1, %s659_s20 }
   0x6   : > { %p32_p0 = scmp.ge.s32.totalorder %s30_s26, 2  ;;  %p161_p1 = scmp.ne.s32.totalorder %s659_s20, %s655_s19 }
   0x7   : > { %p162_p2 = scmp.eq.s32.totalorder %s506_s24, 1  ;;  %p167_p3 = scmp.ne.s32.totalorder %s655_s19, %s651_s18 }
   0x8   : > { %s846_s26 = smov (%p32_p0, %s30_s26), 0  ;;  %p168_p5 = scmp.eq.s32.totalorder %s507_s25, 1 }
   0x9   : > { %p745_p4 = por %p162_p2, %p161_p1  ;;  %s146_s29 = ssub.s32 %s667_s22, %s846_s26 }
   0xa   : > { %p510_p6 = scmp.ge.s32.totalorder %s671_s23, 1  ;;  %p149_p7 = scmp.eq.s32.totalorder %s146_s29, 0 }
   0xb   : > { %p752_p8 = por %p168_p5, %p167_p3  ;;  %p211_p9 = scmp.lt.s32.totalorder %s671_s23, 3 }
   0xc   : > { %s758_s6 = scalar_select %p149_p7, %s659_s20, %s151_s27  }
   0xd   : > { %p212_p10 = pnand %p510_p6, %p211_p9 }
   0xe   : > { %p244_p11 = scmp.lt.s32.totalorder (!%p212_p10), %s663_s21, 1  ;;  %v673_v0 = vmov (!%p212_p10), 0   ;;  %v263_v1 = vld [vmem:[%s834_s2] sm:$0xff] (!%p212_p10)  ;;  %v264_v2 = vld [vmem:[%s834_s2 + $0x8] sm:$0xff] (!%p212_p10)  ;;  %vm284_vm0 = vcmask (!%p212_p10), 1041408   ;;  %vm280_vm1 = vcmask (!%p212_p10), 31744  }
   0xf   : > { %215 = sbr.rel (%p212_p10) target bundleno = 506 (0x1fa), region = 40  ;;  %323 = vmatprep.mubr.bf16.mxu0 (!%p212_p10), %v673_v0  ;;  %581 = vset.pattern.permute.xlu0 (!%p212_p10), %v673_v0  ;;  %v584_v8 = vld [vmem:[%s833_s1] sm:$0xff] (!%p212_p10)   ;;  %vm363_vm2 = vcmask (!%p212_p10), 130048   ;;  %s240_s7 = sand.u32 (!%p212_p10), 1, %s655_s19  }
  0x10   : > { %267 = vperm.xlu0 (!%p212_p10), %581, %v263_v1   ;;  %399 = vmatprep.mubr.bf16.mxu1 (!%p212_p10), %v673_v0  ;;  %v357_v9 = vld [vmem:[%s836_s4] sm:$0xf] (!%p212_p10)  ;;  %s511_s8 = sshll.u32 (!%p212_p10), %s240_s7, 3 }
  0x11   : > { %582 = vset.pattern.permute.xlu1 (!%p212_p10), %v673_v0  ;;  %v354_v42 = vld [vmem:[%s835_s3] sm:$0x3] (!%p212_p10)  ;;  %s242_s10 = scalar_lea.vmem (!%p212_p10), [#allocation2], %s511_s8 }
  0x12   : > { %360 = vperm.xlu1 (!%p212_p10), %582, %v357_v9   ;;  %s430_s11 = sshll.u32 (!%p212_p10), %s242_s10, 4  ;;  %s787_s11 = int_to_ptr.vmem [resolvable:$true] %s430_s11 }
  0x13   : > { %s593_s16 = scalar_lea.vmem (!%p212_p10), %s787_s11, 128 }
  0x14   : > { %272 = vperm.xlu0 (!%p212_p10), %581, %v264_v2   ;;  %p594_p12 = scmp.ne.s32.totalorder (!%p212_p10), %s787_s11, %s593_s16 }
  0x16   : > { %s245_s9 = scalar_select %p244_p11, %s663_s21, 1 }
  0x17   : > { %p595_p13 = pnand %p594_p12, %p745_p4 }
  0x18   : > { %s523_s12 = sshll.u32 %s245_s9, 3  ;;  %s524_s9 = sshll.u32 %s663_s21, 7 }
  0x19   : > { %s251_s15 = scalar_lea.vmem %s832_s0, %s523_s12  ;;  %s785_s14 = scalar_lea.hbm %s837_s5, %s524_s9 }
  0x1a   : > { %v255_v3 = vld [vmem:[%s251_s15] sm:$0xff]  ;;  %s414_s15 = scalar_lea.sflag [#allocation3], %s240_s7  ;;  %p596_p0 = pneg %p595_p13 }
  0x1b   : > { %v257_v4 = vcombine.high %v255_v3, %v255_v3  ;;  %v259_v5 = vpack.c.bf16 %v255_v3, %v255_v3  ;;  %s674_s21 = smov [#allocation2]  }
  0x1c   : > { %s597_s17 = sshll.u32 %s674_s21, 4  ;;  %s598_s17 = int_to_ptr.vmem [resolvable:$false] %s597_s17 }
  0x1d   : > { %v260_v6 = vpack.c.bf16 %v257_v4, %v257_v4  ;;  %v286_v7 = vsel %vm284_vm0, %v259_v5, 0  ;;  %s599_s24 = scalar_lea.vmem %s598_s17, 256  ;;  %p600_p1 = scmp.lt.s32.totalorder %s787_s11, %s598_s17 }
  0x1e   : > { %p601_p2 = scmp.lt.s32.totalorder %s599_s24, %s593_s16 }
  0x1f   : > { %515 = vmatprep.subr.msk.bf16.mxu0 %vm284_vm0, %v260_v6 }
  0x20   : > { %292 = vmatpush1.bf16.msra.mxu0 %v286_v7  ;;  %p602_p3 = por %p601_p2, %p600_p1 }
  0x22   : > { %p603_p5 = pnand %p602_p3, %p596_p0 }
  0x23   : > { %516 = vmatmul.mubr.msk.bf16.vlgmr.msra.gmra.mrb[0].mxu0 %vm280_vm1, %v584_v8 }
  0x8f   : > { %v268_v10 = vpop.permute.xlu0 %267 }
  0x91   : > { %v361_v43 = vpop.permute.xlu1 %360 }
  0x93   : > { %v273_v14 = vpop.permute.xlu0 %272 }
  0xf6   : > { %v325_v11 = vpop.f32.mrb[0].mxu0 }
  0xf7   : > { %v326_v12 = vadd.f32 %v325_v11, %v268_v10  ;;  %v327_v13 = vpop.f32.mrb[1].mxu0 }
  0xf8   : > { %v328_v15 = vadd.f32 %v327_v13, %v268_v10  ;;  %v329_v16 = vpop.f32.mrb[2].mxu0 }
  0xf9   : > { %v338_v17 = vmul.f32 0.70710677, %v326_v12  ;;  %v330_v18 = vadd.f32 %v329_v16, %v273_v14  ;;  %v331_v19 = vpop.f32.mrb[3].mxu0  ;;  %v334_v30 = vmul.f32 0.5, %v326_v12 }
  0xfa   : > { %v339_v20 = vmul.f32 0.70710677, %v328_v15  ;;  %v332_v21 = vadd.f32 %v331_v19, %v273_v14  ;;  %v335_v33 = vmul.f32 0.5, %v328_v15 }
  0xfb   : > { %585 = verf.f32 %v338_v17  ;;  %v340_v22 = vmul.f32 0.70710677, %v330_v18  ;;  %v336_v31 = vmul.f32 0.5, %v330_v18 }
  0xfc   : > { %587 = verf.f32 %v339_v20  ;;  %v341_v23 = vmul.f32 0.70710677, %v332_v21  ;;  %v337_v34 = vmul.f32 0.5, %v332_v21 }
  0xfd   : > { %589 = verf.f32 %v340_v22 }
  0xfe   : > { %591 = verf.f32 %v341_v23 }
 0x105   : > { %v586_v24 = vpop.eup %585 }
 0x106   : > { %v588_v25 = vpop.eup %587  ;;  %v346_v26 = vadd.f32 1.0, %v586_v24 }
 0x107   : > { %v590_v27 = vpop.eup %589  ;;  %v347_v28 = vadd.f32 1.0, %v588_v25 }
 0x108   : > { %v592_v29 = vpop.eup %591  ;;  %v348_v32 = vadd.f32 1.0, %v590_v27  ;;  %v350_v36 = vmul.f32 %v346_v26, %v334_v30 }
 0x109   : > { %v349_v35 = vadd.f32 1.0, %v592_v29  ;;  %v351_v38 = vmul.f32 %v347_v28, %v335_v33 }
 0x10a   : > { %v352_v37 = vmul.f32 %v348_v32, %v336_v31 }
 0x10b   : > { %v353_v39 = vmul.f32 %v349_v35, %v337_v34 }
 0x10c   : > { %v355_v40 = vpack.c.bf16 %v352_v37, %v350_v36 }
 0x10d   : > { %v356_v41 = vpack.c.bf16 %v353_v39, %v351_v38 }
 0x10f   : > { %367 = vmatprep.subr.bf16.mxu1 %v356_v41 }
 0x110   : > { %368 = vmatpush1.bf16.msra.mxu1 %v355_v40 }
 0x113   : > { %517 = vmatmul.mubr.msk.bf16.vlgmr.msra.gmra.mrb[0].mxu1 %vm363_vm2, %v354_v42 }
 0x1e6   : > { %v401_v44 = vpop.f32.mrb[0].mxu1 }
 0x1e7   : > { %v402_v45 = vadd.f32 %v401_v44, %v361_v43  ;;  %v403_v46 = vpop.f32.mrb[1].mxu1 }
 0x1e8   : > { %v404_v47 = vadd.f32 %v403_v46, %v361_v43  ;;  %v405_v48 = vpop.f32.mrb[2].mxu1 }
 0x1e9   : > { %v406_v49 = vpop.f32.mrb[3].mxu1 }
 0x1ea   : > { %v410_v50 = vcombine.low %v402_v45, %v404_v47 }
 0x1ec   : > { %412 = vst [vmem:[%s242_s10] sm:$0xff] %v410_v50 }
 0x1ed   : > { %606 = shalt.err (!%p603_p5)
}
 0x1ee   : > { %s607_s25 = scalar_lea.hbm %s785_s14, 128  ;;  %s611_s7 = scalar_lea.hbm %s837_s5, 256 }
 0x1ef   : > { %p608_p6 = scmp.ne.s32.totalorder %s785_s14, %s607_s25  ;;  %p612_p10 = scmp.lt.u32.totalorder %s785_s14, %s837_s5 }
 0x1f0   : > { %p613_p11 = scmp.lt.u32.totalorder %s611_s7, %s607_s25  ;;  %p615_p13 = scmp.lt.u32.totalorder %s607_s25, %s785_s14 }
 0x1f1   : > { %p609_p7 = pnand %p608_p6, %p745_p4 }
 0x1f2   : > { %p614_p12 = por %p613_p11, %p612_p10 }
 0x1f3   : > { %p610_p9 = pneg %p609_p7 }
 0x1f4   : > { %p616_p0 = por %p615_p13, %p614_p12 }
 0x1f6   : > { %p617_p1 = pnand %p616_p0, %p610_p9 }
 0x1f8   : > { %620 = shalt.err (!%p617_p1)
}
 0x1f9   : > { %525 = dma.vmem_to_hbm [thread:$0]  (%p745_p4), %s787_s11, 128, %s785_s14, %s414_s15  }
 0x1fa PF: > { %p531_p2 = scmp.ge.s32.totalorder %s671_s23, 2  ;;  %s442_s10 = sand.u32 1, %s651_s18  }
 0x1fb   : > { %s443_s12 = scalar_lea.sflag [#allocation3], %s442_s10 }
 0x1fc   : > { %p528_p3 = pnand %p531_p2, %p752_p8 }
 0x1fe   : > { %646 = dma.done.wait (!%p528_p3), %s443_s12, 128  }
 0x1ff   : > { %648 = vsyncadd (!%p528_p3), %s443_s12, 4294967168  ;;  %s18_s23 = sadd.s32 1, %s671_s23   ;;  %s840_s18 = smov %s655_s19 }
 0x200   : > { %p15_p5 = scmp.ge.s32.totalorder %s18_s23, 4   ;;  %s841_s19 = smov %s659_s20 }
 0x201   : > { %s842_s20 = smov %s758_s6  ;;  %s843_s21 = smov %s667_s22 }
 0x202   : > { %s844_s22 = smov %s846_s26  ;;  %17 = sbr.rel (!%p15_p5) target bundleno = 4 (0x4), region = 75 }
 0x209   :  { %448 = vsyncpa [#allocation3], 1 }
 0x20a   :  { %450 = vsyncpa [#allocation3 + $0x1], 1 }

</bundles_post_ra>
